<compile_context>
chip_gen: v5e
topology: v5e:2x2
jax: 0.10.0
libtpu: 0.0.40
codegen_flags: <defaults>
</compile_context>

<pallas_src>
import jax
import jax.numpy as jnp
from jax.experimental import pallas as pl
from jax.experimental.pallas import tpu as pltpu


def nearest_embed_kernel(x_ref, emb_ref, e2_ref, out_ref):
    # x_ref:   (D, TILE_N) latent block for one (codebook, batch, N-tile)
    # emb_ref: (D, K)      codebook weights for this codebook
    # e2_ref:  (K, 1)      precomputed ||e_k||^2 (f32)
    # out_ref: (D, TILE_N) quantized output (same layout as input)
    e = emb_ref[...].astype(jnp.float32)                          # (D, K)
    D, K = e.shape
    x = x_ref[...].astype(jnp.float32)                            # (D, TN)
    TN = x.shape[1]
    e2 = e2_ref[...]                                              # (K, 1)

    # Fold the -2 into the tiny (D,K) tile (one VALU op on D*K elements
    # instead of one per K*TN element).
    e_m2 = -2.0 * e                                               # (D, K)

    # d_{k,n} = ||e_k||^2 - 2<e_k, x_n>   (||x_n||^2 dropped: constant over k,
    # argmin and tie-breaking unchanged).
    d = jax.lax.dot_general(
        e_m2, x,
        dimension_numbers=(((0,), (0,)), ((), ())),
        preferred_element_type=jnp.float32) + e2                  # (K, TN)

    # argmin over K (sublane axis) with first-index tie-break, matching
    # torch .min(-1) semantics.  iota built once per grid step.
    mind = jnp.min(d, axis=0, keepdims=True)                      # (1, TN)
    iota = jax.lax.broadcasted_iota(jnp.int32, (K, TN), 0)        # (K, TN)
    idx = jnp.min(jnp.where(d <= mind, iota, K), axis=0,
                  keepdims=True)                                  # (1, TN)

    # Gather selected embeddings via one-hot matmul (exact codebook rows,
    # f32): (D,K) @ (K,TN) -> (D,TN), already lane-dense output layout.
    onehot = (iota == idx).astype(jnp.float32)                    # (K, TN)
    q = jnp.dot(e, onehot, preferred_element_type=jnp.float32)    # (D, TN)
    out_ref[...] = q.astype(out_ref.dtype)


def multi_cookbook_forward(x, weights, *, target_tile_n=2048):
    """x: (B, 3, D, H, W); weights: (3, D, K). Returns (z_q, emb)."""
    B, C, D, H, W = x.shape
    assert C == 3
    assert weights.shape[0] == 3 and weights.shape[1] == D
    K = weights.shape[2]
    N = H * W

    # ---- Generation-aware VMEM budgeting (v7x: 64 MiB, v5e/v6e: 128 MiB) ---
    try:
        vmem_cap = int(pltpu.get_tpu_info().vmem_capacity_bytes)
    except Exception:
        vmem_cap = 64 * 1024 * 1024
    vmem_budget = vmem_cap // 4            # keep ample pipelining headroom
    itemsize = jnp.dtype(x.dtype).itemsize
    # Rough bytes-per-lane: double-buffered in+out blocks (2*2*D*itemsize)
    # plus in-kernel f32 temporaries (x/q ~2D, d/iota/where/onehot ~4K).
    bytes_per_lane = 4 * D * itemsize + (2 * D + 4 * K) * 4
    cap = max(128, (vmem_budget // max(bytes_per_lane, 1)) // 128 * 128)
    tile_target = max(128, min(target_tile_n, cap))

    # ---- Lane-dense N tiling: pad N to a multiple of 128, pick TILE_N as the
    # largest multiple-of-128 divisor of padded N that fits the budget. ------
    n128 = -(-N // 128) * 128
    tile_n = 128
    t = min(tile_target, n128)
    while t >= 128:
        if n128 % t == 0:
            tile_n = t
            break
        t -= 128
    n_pad = n128
    n_tiles = n_pad // tile_n

    # Metadata-only reshape; pad spatial axis with zeros if needed (padded
    # columns are sliced off after the kernel, so correctness is unaffected).
    x_flat = x.reshape(B, 3, D, N)
    if n_pad != N:
        x_flat = jnp.pad(x_flat, ((0, 0), (0, 0), (0, 0), (0, n_pad - N)))

    # Precompute ||e_k||^2 once in the wrapper (tiny (3, K, 1), f32).
    w_f32 = weights.astype(jnp.float32)
    e2 = jnp.sum(w_f32 * w_f32, axis=1)[:, :, None]               # (3, K, 1)

    # Grid: (codebook, batch, N-tile), all independent -> "parallel".
    def x_map(c, b, n):
        return (b, c, 0, n)

    def w_map(c, b, n):
        return (c, 0, 0)

    out = pl.pallas_call(
        nearest_embed_kernel,
        out_shape=jax.ShapeDtypeStruct((B, 3, D, n_pad), x.dtype),
        grid=(3, B, n_tiles),
        in_specs=[
            pl.BlockSpec((None, None, D, tile_n), x_map),   # batch & codebook squeezed
            pl.BlockSpec((None, D, K), w_map),              # codebook squeezed
            pl.BlockSpec((None, K, 1), w_map),              # codebook squeezed
        ],
        out_specs=pl.BlockSpec((None, None, D, tile_n), x_map),
        compiler_params=pltpu.CompilerParams(
            dimension_semantics=("parallel", "parallel", "parallel"),
            vmem_limit_bytes=int(min(vmem_cap // 2, 128 * 1024 * 1024)),
        ),
    )(x_flat, weights, e2)

    if n_pad != N:
        out = out[:, :, :, :N]
    zq = out.reshape(B, 3, D, H, W)
    # Forward values of z_q and emb are identical (they differ only in
    # gradient flow through detach / weight_sg, irrelevant for forward).
    # TODO(synk): straight-through / codebook gradients need a custom_vjp.
    return zq, zq


def _reference_forward(x, weights):
    """Pure-JAX reference of the same computation (for sanity check)."""
    B, C, D, H, W = x.shape
    outs = []
    for c in range(3):
        xc = jnp.transpose(x[:, c], (0, 2, 3, 1)).reshape(-1, D)    # (BHW, D)
        e = weights[c]                                              # (D, K)
        dist = jnp.sum((xc[:, :, None] - e[None, :, :]) ** 2, axis=1)
        idx = jnp.argmin(dist, axis=-1)
        q = e.T[idx]                                                # (BHW, D)
        outs.append(jnp.transpose(q.reshape(B, H, W, D), (0, 3, 1, 2)))
    zq = jnp.stack(outs, axis=1)                                    # (B,3,D,H,W)
    return zq, zq


if __name__ == "__main__":
    # Module hyperparameters: multiCookbook(k, dim)
    k = 16      # num_embeddings per codebook
    dim = 8     # embedding dim
    B, H, W = 2, 16, 16   # spatial 16x16 -> N = 256 lanes (lane-dense)

    key = jax.random.PRNGKey(0)
    kx, kw1, kw2, kw3 = jax.random.split(key, 4)

    # Input: (B, 3, dim, H, W) — x[:, c] feeds codebook c (emb_dim = dim)
    x = jax.random.normal(kx, (B, 3, dim, H, W), dtype=jnp.float32)

    # Deterministic codebook weights, mimicking torch.rand(dim, k) ~ U[0, 1)
    w = jnp.stack([
        jax.random.uniform(kw1, (dim, k), dtype=jnp.float32),
        jax.random.uniform(kw2, (dim, k), dtype=jnp.float32),
        jax.random.uniform(kw3, (dim, k), dtype=jnp.float32),
    ], axis=0)  # (3, dim, k)

    z_q, emb = multi_cookbook_forward(x, w)
    jax.block_until_ready(z_q)
    jax.block_until_ready(emb)

    z_ref, _ = _reference_forward(x, w)
    assert z_q.shape == (B, 3, dim, H, W)
    assert jnp.allclose(z_q, z_ref, atol=1e-5), "mismatch vs reference"
    assert jnp.allclose(emb, z_ref, atol=1e-5), "mismatch vs reference"

    print("KERNEL_OK")
</pallas_src>

<mosaic_0001>
module attributes {stable_mosaic.version = 11 : i64} {
  func.func @nearest_embed_kernel(%arg0: i32, %arg1: i32, %arg2: i32, %arg3: memref<1x1x8x256xf32, #tpu.memory_space<vmem>>, %arg4: memref<1x8x16xf32, #tpu.memory_space<vmem>>, %arg5: memref<1x16x1xf32, #tpu.memory_space<vmem>>, %arg6: memref<1x1x8x256xf32, #tpu.memory_space<vmem>>) attributes {dimension_semantics = [#tpu.dimension_semantics<parallel>, #tpu.dimension_semantics<parallel>, #tpu.dimension_semantics<parallel>], iteration_bounds = array<i64: 3, 2, 1>, scalar_prefetch = 0 : i64, scratch_operands = 0 : i64, tpu.core_type = #tpu.core_type<tc>, window_params = [{transform_indices = @transform_0, window_bounds = array<i64: 1, 1, 8, 256>}, {transform_indices = @transform_1, window_bounds = array<i64: 1, 8, 16>}, {transform_indices = @transform_2, window_bounds = array<i64: 1, 16, 1>}, {transform_indices = @transform_3, window_bounds = array<i64: 1, 1, 8, 256>}]} {
    %c0 = arith.constant 0 : index
    %c0_0 = arith.constant 0 : index
    %c0_1 = arith.constant 0 : index
    %0 = vector.load %arg4[%c0, %c0_0, %c0_1] : memref<1x8x16xf32, #tpu.memory_space<vmem>>, vector<1x8x16xf32>
    %1 = vector.shape_cast %0 : vector<1x8x16xf32> to vector<8x16xf32>
    %c0_2 = arith.constant 0 : index
    %c0_3 = arith.constant 0 : index
    %c0_4 = arith.constant 0 : index
    %c0_5 = arith.constant 0 : index
    %2 = vector.load %arg3[%c0_2, %c0_3, %c0_4, %c0_5] : memref<1x1x8x256xf32, #tpu.memory_space<vmem>>, vector<1x1x8x256xf32>
    %3 = vector.shape_cast %2 : vector<1x1x8x256xf32> to vector<8x256xf32>
    %c0_6 = arith.constant 0 : index
    %c0_7 = arith.constant 0 : index
    %c0_8 = arith.constant 0 : index
    %4 = vector.load %arg5[%c0_6, %c0_7, %c0_8] : memref<1x16x1xf32, #tpu.memory_space<vmem>>, vector<1x16x1xf32>
    %5 = vector.shape_cast %4 : vector<1x16x1xf32> to vector<16x1xf32>
    %cst = arith.constant -2.000000e+00 : f32
    %6 = vector.broadcast %cst : f32 to vector<8x16xf32>
    %7 = arith.mulf %6, %1 : vector<8x16xf32>
    %cst_9 = arith.constant dense<0.000000e+00> : vector<16x256xf32>
    %8 = tpu.matmul %7, %3, %cst_9 {dimension_numbers = #tpu.dot_dimension_numbers<[0], [0], [1], [1], [0, 1, 1, 1], [], []>} : vector<8x16xf32>, vector<8x256xf32>, vector<16x256xf32> -> vector<16x256xf32>
    %9 = vector.broadcast %5 : vector<16x1xf32> to vector<16x256xf32>
    %10 = arith.addf %8, %9 : vector<16x256xf32>
    %cst_10 = arith.constant dense<0x7F800000> : vector<256xf32>
    %11 = vector.multi_reduction <minimumf>, %10, %cst_10 [0] : vector<16x256xf32> to vector<256xf32>
    %12 = vector.shape_cast %11 : vector<256xf32> to vector<1x256xf32>
    %13 = tpu.iota {dimensions = array<i32: 0>} : vector<16x256xi32>
    %14 = vector.broadcast %12 : vector<1x256xf32> to vector<16x256xf32>
    %15 = arith.cmpf ole, %10, %14 : vector<16x256xf32>
    %c16_i32 = arith.constant 16 : i32
    %16 = vector.broadcast %c16_i32 : i32 to vector<16x256xi32>
    %17 = arith.select %15, %13, %16 : vector<16x256xi1>, vector<16x256xi32>
    %cst_11 = arith.constant dense<2147483647> : vector<256xi32>
    %18 = vector.multi_reduction <minsi>, %17, %cst_11 [0] : vector<16x256xi32> to vector<256xi32>
    %19 = vector.shape_cast %18 : vector<256xi32> to vector<1x256xi32>
    %20 = vector.broadcast %19 : vector<1x256xi32> to vector<16x256xi32>
    %21 = arith.cmpi eq, %13, %20 : vector<16x256xi32>
    %22 = arith.extui %21 : vector<16x256xi1> to vector<16x256xi32>
    %23 = arith.sitofp %22 : vector<16x256xi32> to vector<16x256xf32>
    %cst_12 = arith.constant dense<0.000000e+00> : vector<8x256xf32>
    %24 = tpu.matmul %1, %23, %cst_12 {dimension_numbers = #tpu.dot_dimension_numbers<[1], [0], [0], [1], [0, 0, 1, 1], [], []>} : vector<8x16xf32>, vector<16x256xf32>, vector<8x256xf32> -> vector<8x256xf32>
    %c0_13 = arith.constant 0 : index
    %c0_14 = arith.constant 0 : index
    %c0_15 = arith.constant 0 : index
    %c0_16 = arith.constant 0 : index
    %25 = vector.load %arg6[%c0_13, %c0_14, %c0_15, %c0_16] : memref<1x1x8x256xf32, #tpu.memory_space<vmem>>, vector<1x1x8x256xf32>
    %26 = vector.shape_cast %25 : vector<1x1x8x256xf32> to vector<8x256xf32>
    %27 = vector.shape_cast %24 : vector<8x256xf32> to vector<1x1x8x256xf32>
    tpu.vector_store %arg6[%c0_13, %c0_14, %c0_15, %c0_16], %27 {strides = array<i32>} : memref<1x1x8x256xf32, #tpu.memory_space<vmem>>, vector<1x1x8x256xf32>,
    return
  }
  func.func @transform_0(%arg0: i32, %arg1: i32, %arg2: i32) -> (i32, i32, i32, i32) {
    %c0_i32 = arith.constant 0 : i32
    %c0_i32_0 = arith.constant 0 : i32
    return %arg1, %arg0, %c0_i32, %arg2 : i32, i32, i32, i32
  }
  func.func @transform_1(%arg0: i32, %arg1: i32, %arg2: i32) -> (i32, i32, i32) {
    %c0_i32 = arith.constant 0 : i32
    %c0_i32_0 = arith.constant 0 : i32
    %c0_i32_1 = arith.constant 0 : i32
    return %arg0, %c0_i32, %c0_i32_0 : i32, i32, i32
  }
  func.func @transform_2(%arg0: i32, %arg1: i32, %arg2: i32) -> (i32, i32, i32) {
    %c0_i32 = arith.constant 0 : i32
    %c0_i32_0 = arith.constant 0 : i32
    %c0_i32_1 = arith.constant 0 : i32
    return %arg0, %c0_i32, %c0_i32_0 : i32, i32, i32
  }
  func.func @transform_3(%arg0: i32, %arg1: i32, %arg2: i32) -> (i32, i32, i32, i32) {
    %c0_i32 = arith.constant 0 : i32
    %c0_i32_0 = arith.constant 0 : i32
    return %arg1, %arg0, %c0_i32, %arg2 : i32, i32, i32, i32
  }
}

</mosaic_0001>

<bundles_post_ra>
// kernel: tpu_custom_call.1
= control target key start
LH: loop header
LB: loop body
LE: loop exit
PB: predicated region body
PF: predicated region fallthrough
CT: control target
= control target key end

     0   :  { %8 = vsyncpa [#allocation3], 0  ;;  %s1033_s0 = inlined_call_operand.hbm [shape: f32[2,3,8,256], index: 0, kind: input, shape index: {}]   ;;  %s1034_s1 = inlined_call_operand.vmem [shape: f32[3,8,16], index: 1, kind: input, shape index: {}]   ;;  %s1035_s2 = inlined_call_operand.vmem [shape: f32[3,16,1], index: 2, kind: input, shape index: {}]   ;;  %s1036_s3 = inlined_call_operand.hbm [shape: f32[2,3,8,256], index: 3, kind: output, shape index: {}]  }
   0x1   :  { %10 = vsyncpa [#allocation3 + $0x1], 0 }
   0x2   :  { %11 = vsyncpa [#allocation4], 0 }
   0x3   :  { %13 = vsyncpa [#allocation4 + $0x1], 0  ;;  %s874_s12 = smov 0   ;;  %s876_s13 = smov 0  }
   0x4   :  { %s878_s14 = smov 0   ;;  %s880_s15 = smov 0  }
   0x5   :  { %s882_s16 = smov 0   ;;  %s884_s17 = smov 0  }
   0x6   :  { %s886_s18 = smov 0   ;;  %s888_s19 = smov 0  }
   0x7 LB: > { %s604_s20 = sadd.s32 4294967295, %s850_s19   ;;  %s605_s21 = sadd.s32 4294967294, %s850_s19   ;;  %s850_s19 = sphi %s888_s19, %s19_s19   ;;  %s846_s18 = sphi %s886_s18, %s1050_s18   ;;  %s842_s17 = sphi %s884_s17, %s1049_s17   ;;  %s838_s16 = sphi %s882_s16, %s1048_s16   ;;  %s834_s15 = sphi %s880_s15, %s1047_s15   ;;  %s830_s14 = sphi %s878_s14, %s1046_s14   ;;  %s826_s13 = sphi %s876_s13, %s1045_s13   ;;  %s822_s12 = sphi %s874_s12, %s1044_s12  }
   0x8   : > { %s34_s22 = sadd.s32 1, %s842_s17  ;;  %s38_s23 = sadd.s32 1, %s846_s18 }
   0x9   : > { %p36_p0 = scmp.ge.s32.totalorder %s34_s22, 2  ;;  %s49_s24 = sadd.s32 1, %s830_s14 }
   0xa   : > { %p56_p1 = scmp.ne.s32.totalorder %s830_s14, %s826_s13  ;;  %p57_p2 = scmp.eq.s32.totalorder %s850_s19, 0 }
   0xb   : > { %s1052_s22 = smov (%p36_p0, %s34_s22), 0  ;;  %s1054_s23 = smov (!%p36_p0, %s38_s23), %s846_s18 }
   0xc   : > { %s42_s25 = ssub.s32 %s842_s17, %s1052_s22  ;;  %p927_p3 = por %p57_p2, %p56_p1 }
   0xd   : > { %p40_p4 = scmp.ge.s32.totalorder %s1054_s23, 3  ;;  %p62_p5 = scmp.ne.s32.totalorder %s826_s13, %s822_s12 }
   0xe   : > { %p63_p6 = scmp.eq.s32.totalorder %s604_s20, 0  ;;  %p142_p7 = scmp.eq.s32.totalorder %s604_s20, 5 }
   0xf   : > { %s1056_s23 = smov (%p40_p4, %s1054_s23), 0  ;;  %p148_p10 = scmp.eq.s32.totalorder %s605_s21, 5 }
  0x10   : > { %1039 = sst [smem:[#allocation8_spill]] %s1056_s23  ;;  %p935_p8 = por %p63_p6, %p62_p5 }
  0x11   : > { %p939_p9 = por %p142_p7, %p56_p1  ;;  %s43_s29 = ssub.s32 %s846_s18, %s1056_s23 }
  0x12   : > { %s44_s30 = sor.u32 %s43_s29, %s42_s25  ;;  %p945_p12 = por %p148_p10, %p62_p5 }
  0x13   : > { %p47_p11 = scmp.eq.s32.totalorder %s44_s30, 0  ;;  %p651_p13 = scmp.lt.s32.totalorder %s850_s19, 6 }
  0x14   : > { %s168_s5 = sand.u32 1, %s830_s14   ;;  %s609_s8 = sshll.u32 %s846_s18, 1 }
  0x15   : > { %s952_s6 = scalar_select %p47_p11, %s830_s14, %s49_s24  }
  0x16   : > { %s608_s7 = sshll.u32 %s168_s5, 4  ;;  %s637_s9 = smul.u32 6, %s842_s17 }
  0x17   : > { %s172_s10 = scalar_lea.vmem [#allocation2], %s608_s7  ;;  %p644_p0 = pnand %p651_p13, %p927_p3 }
  0x18   : > { %s185_s11 = sshll.u32 %s172_s10, 4  ;;  %s179_s20 = sadd.s32 %s637_s9, %s609_s8  ;;  %s186_s11 = int_to_ptr.vmem [resolvable:$true] %s185_s11 }
  0x19   : > { %p611_p1 = scmp.ge.s32.totalorder %s850_s19, 1  ;;  %s610_s21 = sshll.u32 %s179_s20, 3 }
  0x1a   : > { %s181_s30 = scalar_lea.hbm %s1033_s0, %s610_s21  ;;  %p205_p2 = scmp.lt.s32.totalorder %s850_s19, 7 }
  0x1b   : > { %s183_s23 = sshll.u32 %s181_s30, 4  ;;  %s169_s24 = scalar_lea.sflag [#allocation3], %s168_s5  ;;  %s184_s23 = int_to_ptr.hbm [resolvable:$true] %s183_s23 }
  0x1c   : > { %p206_p4 = pnand %p611_p1, %p205_p2 }
  0x1d   : > { %646 = dma.hbm_to_vmem [thread:$0]  (!%p644_p0), %s184_s23, 256, %s186_s11, %s169_s24  }
  0x1e   : > { %209 = sbr.rel (%p206_p4) target bundleno = 516 (0x204), region = 32  ;;  %s964_s7 = sand.u32 (!%p206_p4), 1, %s826_s13  }
  0x1f   : > { %s612_s26 = sshll.u32 (!%p206_p4), %s964_s7, 4  ;;  %s212_s8 = scalar_lea.sflag (!%p206_p4), [#allocation3], %s964_s7 }
  0x20   : > { %s215_s9 = scalar_lea.vmem (!%p206_p4), [#allocation2], %s612_s26 }
  0x23   : > { %813 = dma.done.wait (%p935_p8), %s212_s8, 256  }
  0x24   : > { %815 = vsyncadd (%p935_p8), %s212_s8, 4294967040  ;;  %p249_p3 = scmp.lt.s32.totalorder %s838_s16, 2  ;;  %v260_v1 = vld [vmem:[%s215_s9] sm:$0xff]  ;;  %v261_v2 = vld [vmem:[%s215_s9 + $0x8] sm:$0xff]  ;;  %v852_v6 = vmov 0   ;;  %vm307_vm0 = vcmask 64512   ;;  %v374_v23 = vlaneseq }
  0x25   : > { %329 = vmatpush.msra.mxu0 %v260_v1  ;;  %352 = vmatpush.msra.mxu1 %v261_v2  ;;  %v853_v54 = vmov 1.0   ;;  %vm419_vm15 = vcmask 130048   ;;  %s638_s30 = smul.u32 6, %s834_s15  ;;  %s632_s24 = sshll.u32 %s838_s16, 1 }
  0x26   : > { %s250_s23 = scalar_select %p249_p3, %s838_s16, 2  ;;  %721 = vset.pattern.permute.xlu1 %v852_v6  ;;  %v375_v28 = vshrl.u32 %v374_v23, 7 }
  0x27   : > { %s479_s8 = sadd.s32 %s638_s30, %s632_s24  ;;  %s247_s11 = scalar_lea.vmem [#allocation5], %s612_s26 }
  0x28   : > { %s614_s5 = sshll.u32 %s250_s23, 3  ;;  %s636_s27 = sshll.u32 %s250_s23, 4  ;;  %v376_v33 = vadd.s32 8, %v375_v28 }
  0x29   : > { %s252_s20 = scalar_lea.vmem %s1034_s1, %s614_s5  ;;  %s257_s29 = scalar_lea.vmem %s1035_s2, %s636_s27 }
  0x2a   : > { %v979_v0 = vld [vmem:[%s252_s20] sm:$0xff]  ;;  %v263_v5 = vld [vmem:[%s257_s29 + $0x8] sm:$0xff]  ;;  %s633_s9 = sshll.u32 %s479_s8, 3  ;;  %s483_s20 = sshll.u32 %s247_s11, 4  ;;  %s484_s20 = int_to_ptr.vmem [resolvable:$true] %s483_s20 }
  0x2b   : > { %v264_v3 = vmul.f32 -2.0, %v979_v0  ;;  %v262_v4 = vld [vmem:[%s257_s29] sm:$0xff]  ;;  %272 = vperm.xlu1 %721, %v263_v5   ;;  %s481_s10 = scalar_lea.hbm %s1036_s3, %s633_s9  ;;  %s466_s21 = scalar_lea.sflag [#allocation4], %s964_s7 }
  0x2c   : > { %s485_s27 = sshll.u32 %s481_s10, 4  ;;  %s772_s26 = scalar_lea.hbm %s1036_s3, 96  ;;  %s486_s27 = int_to_ptr.hbm [resolvable:$true] %s485_s27 }
  0x2d   : > { %275 = vxpose.xlu0.b32.start.end [1/1] (short) (narrow) %v264_v3, 16  ;;  %s766_s15 = sshra.s32 %s486_s27, 4  ;;  %s767_s15 = int_to_ptr.hbm [resolvable:$true] %s766_s15 }
  0x2e   : > { %s768_s16 = scalar_lea.hbm %s767_s15, 16  ;;  %p773_p8 = scmp.lt.s32.totalorder %s767_s15, %s1036_s3 }
  0x2f   : > { %p769_p5 = scmp.ne.s32.totalorder %s767_s15, %s768_s16  ;;  %p774_p10 = scmp.lt.s32.totalorder %s772_s26, %s768_s16 }
  0x31   : > { %p770_p6 = pnand %p769_p5, %p939_p9  ;;  %p775_p11 = por %p774_p10, %p773_p8 }
  0x33   : > { %p771_p7 = pneg %p770_p6 }
  0x35   : > { %p776_p13 = pnand %p775_p11, %p771_p7 }
  0x94   : > { %720 = vset.pattern.permute.xlu0 %v852_v6 }
  0x9d   : > { %v273_v12 = vpop.permute.xlu1 %272 }
  0xa3   : > { %267 = vperm.xlu0 %720, %v262_v4  }
  0xd1   : > { %v291_v7 = vpop.trf.xlu0 }
  0xd2   : > { %617 = vmatmul.msk.f32.vlgmr.msra.gmra.mxu0 %vm307_vm0, %v291_v7  ;;  %619 = vmatmul.msk.f32.vlgmr.msra.gmra.mxu1 %vm307_vm0, %v291_v7 }
  0xd9   : > { %v292_v8 = vpop.trf.xlu0 }
  0xda   : > { %618 = vmatmul.msk.f32.gmra.mxu0 %vm307_vm0, %v292_v8  ;;  %620 = vmatmul.msk.f32.gmra.mxu1 %vm307_vm0, %v292_v8 }
 0x115   : > { %v268_v11 = vpop.permute.xlu0 %267 }
 0x14f   : > { %v331_v9 = vpop.f32.mrf.mxu0  ;;  %v354_v10 = vpop.f32.mrf.mxu1 }
 0x150   : > { %v332_v15 = vadd.f32 %v331_v9, %v268_v11  ;;  %v355_v16 = vadd.f32 %v354_v10, %v268_v11 }
 0x157   : > { %v334_v13 = vpop.f32.mrf.mxu0  ;;  %v357_v14 = vpop.f32.mrf.mxu1 }
 0x158   : > { %v335_v17 = vadd.f32 %v334_v13, %v273_v12  ;;  %v358_v18 = vadd.f32 %v357_v14, %v273_v12 }
 0x15a   : > { %v360_v19 = vmin.f32 %v332_v15, %v335_v17  ;;  %v367_v20 = vmin.f32 %v355_v16, %v358_v18 }
 0x15c   : > { %v361_v21 = vrot.slane %v360_v19, 4  ;;  %v368_v22 = vrot.slane %v367_v20, 4 }
 0x15e   : > { %v362_v24 = vmin.f32 %v360_v19, %v361_v21  ;;  %v369_v25 = vmin.f32 %v367_v20, %v368_v22 }
 0x160   : > { %v363_v26 = vrot.slane %v362_v24, 2  ;;  %v370_v27 = vrot.slane %v369_v25, 2 }
 0x162   : > { %v364_v29 = vmin.f32 %v362_v24, %v363_v26  ;;  %v371_v30 = vmin.f32 %v369_v25, %v370_v27 }
 0x164   : > { %v365_v31 = vrot.slane %v364_v29, 1  ;;  %v372_v32 = vrot.slane %v371_v30, 1 }
 0x166   : > { %v366_v34 = vmin.f32 %v364_v29, %v365_v31  ;;  %v373_v35 = vmin.f32 %v371_v30, %v372_v32 }
 0x168   : > { %vm377_vm1 = vcmp.le.f32.partialorder %v332_v15, %v366_v34  ;;  %vm379_vm2 = vcmp.le.f32.partialorder %v335_v17, %v366_v34  ;;  %vm378_vm3 = vcmp.le.f32.partialorder %v355_v16, %v373_v35  ;;  %vm380_vm4 = vcmp.le.f32.partialorder %v358_v18, %v373_v35 }
 0x169   : > { %v381_v36 = vsel %vm377_vm1, %v375_v28, 16  ;;  %v383_v37 = vsel %vm379_vm2, %v376_v33, 16  ;;  %v382_v38 = vsel %vm378_vm3, %v375_v28, 16  ;;  %v384_v39 = vsel %vm380_vm4, %v376_v33, 16 }
 0x16a   : > { %vm385_vm5 = vcmp.lt.s32.totalorder %v381_v36, %v383_v37  ;;  %vm396_vm6 = vcmp.lt.s32.totalorder %v382_v38, %v384_v39 }
 0x16b   : > { %v386_v40 = vsel %vm385_vm5, %v381_v36, %v383_v37  ;;  %v397_v41 = vsel %vm396_vm6, %v382_v38, %v384_v39 }
 0x16c   : > { %v387_v42 = vrot.slane %v386_v40, 4  ;;  %v398_v43 = vrot.slane %v397_v41, 4 }
 0x16e   : > { %vm388_vm7 = vcmp.lt.s32.totalorder %v386_v40, %v387_v42  ;;  %vm399_vm8 = vcmp.lt.s32.totalorder %v397_v41, %v398_v43 }
 0x16f   : > { %v389_v44 = vsel %vm388_vm7, %v386_v40, %v387_v42  ;;  %v400_v45 = vsel %vm399_vm8, %v397_v41, %v398_v43 }
 0x170   : > { %v390_v46 = vrot.slane %v389_v44, 2  ;;  %v401_v47 = vrot.slane %v400_v45, 2 }
 0x172   : > { %vm391_vm9 = vcmp.lt.s32.totalorder %v389_v44, %v390_v46  ;;  %vm402_vm10 = vcmp.lt.s32.totalorder %v400_v45, %v401_v47 }
 0x173   : > { %v392_v48 = vsel %vm391_vm9, %v389_v44, %v390_v46  ;;  %v403_v49 = vsel %vm402_vm10, %v400_v45, %v401_v47 }
 0x174   : > { %v393_v50 = vrot.slane %v392_v48, 1  ;;  %v404_v51 = vrot.slane %v403_v49, 1 }
 0x176   : > { %vm394_vm11 = vcmp.lt.s32.totalorder %v392_v48, %v393_v50  ;;  %vm405_vm12 = vcmp.lt.s32.totalorder %v403_v49, %v404_v51 }
 0x177   : > { %v395_v52 = vsel %vm394_vm11, %v392_v48, %v393_v50  ;;  %v406_v53 = vsel %vm405_vm12, %v403_v49, %v404_v51 }
 0x178   : > { %vm409_vm13 = vcmp.eq.s32.totalorder %v376_v33, %v395_v52  ;;  %vm410_vm14 = vcmp.eq.s32.totalorder %v376_v33, %v406_v53  ;;  %vm407_vm0 = vcmp.eq.s32.totalorder %v375_v28, %v395_v52  ;;  %vm408_vm1 = vcmp.eq.s32.totalorder %v375_v28, %v406_v53 }
 0x179   : > { %625 = vmatpush.msk.msra.mxu2 %vm409_vm13, %v853_v54  ;;  %628 = vmatpush.msk.msra.mxu3 %vm410_vm14, %v853_v54 }
 0x17b   : > { %626 = vmatpush.msk.msra.mxu2 %vm407_vm0, %v853_v54  ;;  %629 = vmatpush.msk.msra.mxu3 %vm408_vm1, %v853_v54 }
 0x17c   : > { %627 = vmatmul.msk.f32.vlgmr.msra.gmra.mxu2 %vm419_vm15, %v979_v0  ;;  %630 = vmatmul.msk.f32.vlgmr.msra.gmra.mxu3 %vm419_vm15, %v979_v0 }
 0x1ff   : > { %v440_v55 = vpop.f32.mrf.mxu2  ;;  %v460_v56 = vpop.f32.mrf.mxu3 }
 0x200   : > { %463 = vst [vmem:[%s247_s11] sm:$0xff] %v440_v55 }
 0x201   : > { %464 = vst [vmem:[%s247_s11 + $0x8] sm:$0xff] %v460_v56 }
 0x202   : > { %779 = shalt.err (!%p776_p13)
}
 0x203   : > { %641 = dma.vmem_to_hbm [thread:$0]  (%p939_p9), %s484_s20, 256, %s486_s27, %s466_s21  }
 0x204 PF: > { %p652_p0 = scmp.ge.s32.totalorder %s850_s19, 2  ;;  %s497_s7 = sand.u32 1, %s822_s12  }
 0x205   : > { %s498_s8 = scalar_lea.sflag [#allocation4], %s497_s7 }
 0x206   : > { %p648_p1 = pnand %p652_p0, %p945_p12 }
 0x208   : > { %p649_p2 = pneg %p648_p1 }
 0x20a   : > { %817 = dma.done.wait (%p649_p2), %s498_s8, 256  }
 0x20b   : > { %819 = vsyncadd (%p649_p2), %s498_s8, 4294967040  ;;  %s19_s19 = sadd.s32 1, %s850_s19   ;;  %s1043_s28 = sld [smem:[#allocation8_spill]] }
 0x20c   : > { %p16_p4 = scmp.ge.s32.totalorder %s19_s19, 8   ;;  %s1044_s12 = smov %s826_s13 }
 0x20d   : > { %s1045_s13 = smov %s830_s14  ;;  %s1046_s14 = smov %s952_s6 }
 0x20e   : > { %s1047_s15 = smov %s842_s17  ;;  %s1048_s16 = smov %s846_s18 }
 0x20f   : > { %s1049_s17 = smov %s1052_s22  ;;  %18 = sbr.rel (!%p16_p4) target bundleno = 7 (0x7), region = 83 }
 0x211   : > { %s1050_s18 = smov %s1043_s28 }
 0x214   :  { %504 = vsyncpa [#allocation3], 1 }
 0x215   :  { %506 = vsyncpa [#allocation3 + $0x1], 1 }
 0x216   :  { %507 = vsyncpa [#allocation4], 1 }
 0x217   :  { %509 = vsyncpa [#allocation4 + $0x1], 1 }

</bundles_post_ra>
